<compile_context>
chip_gen: v6e
topology: v6e:2x2x1
jax: 0.10.0
libtpu: 0.0.40
codegen_flags: <defaults>
</compile_context>

<pallas_src>
import functools

import jax
import jax.numpy as jnp
from jax import lax
from jax.experimental import pallas as pl
from jax.experimental.pallas import tpu as pltpu


def _d_to_cloud_kernel(coef_ref, pmat_ref, d_ref, out_ref, *, width):
    # coef_ref : VMEM (1, 3, 384) f32, per-batch lane coefficients:
    #            coef[0,0,l] = inv_K[l%3,0], coef[0,1,l] = inv_K[l%3,1],
    #            coef[0,2,l] = inv_K[l%3,2]
    # pmat_ref : VMEM (128, 384) bf16, one-hot replication matrix P[i,l]=[l//3==i]
    # d_ref    : VMEM (1, rows, 128) depth tile; pixel p = (t*rows + r)*128 + i
    # out_ref  : VMEM (1, rows, 384) interleaved tile:
    #            out[r, 3*i + c] = depth[p] * (K[c,0]*x(p) + K[c,1]*y(p) + K[c,2])
    rows = d_ref.shape[1]
    t = pl.program_id(1)
    w = float(width)
    inv_w = 1.0 / w                       # Python constant -> no runtime divide

    # ---- tiny (1, 384) per-lane pattern: pixel-in-row index q = l // 3 (exact).
    l_pat = lax.broadcasted_iota(jnp.int32, (1, 384), 1).astype(jnp.float32)
    q_pat = jnp.floor((l_pat + 0.5) * (1.0 / 3.0))

    coef = coef_ref[0]                    # (3, 384)
    a_pat = coef[0:1, :]                  # coefficient of x per lane
    b_pat = coef[1:2, :]                  # coefficient of y per lane
    e_pat = coef[2:3, :]                  # constant term per lane

    # ---- per-tile-row divmod: y_base = base_p // W, x_base = base_p % W on
    # (rows, 1) columns only (rows/8 vregs). Float quotient + one correction
    # step => exact for any base_p < 2^23 regardless of reciprocal rounding.
    r_col = lax.broadcasted_iota(jnp.int32, (rows, 1), 0).astype(jnp.float32)
    base_p = (t * rows * 128).astype(jnp.float32) + r_col * 128.0
    q0 = jnp.floor((base_p + 0.5) * inv_w)
    rem = base_p - q0 * w
    under = rem < 0.0
    q0 = jnp.where(under, q0 - 1.0, q0)
    rem = jnp.where(under, rem + w, rem)
    over = rem >= w
    y_base = jnp.where(over, q0 + 1.0, q0)          # (rows, 1)
    x_base = jnp.where(over, rem - w, rem)          # (rows, 1)

    # ---- cam = a*x + b*y + e in the interleaved (rows, 384) space.
    if width % 128 == 0:
        # Each 128-pixel depth row lies inside one image row: x = x_base + q,
        # y = y_base. Only 4 full-size VPU ops.
        ae_pat = a_pat * q_pat + e_pat                       # (1, 384)
        cam = a_pat * x_base + b_pat * y_base + ae_pat
    elif 128 % width == 0:
        # W divides 128: x = q % W and the row offset q // W are lane constants,
        # so cam collapses to one broadcast mul + one add.
        yq = jnp.floor((q_pat + 0.5) * inv_w)                # q // W, (1, 384)
        x_pat = q_pat - w * yq                               # q %  W, (1, 384)
        const_pat = a_pat * x_pat + b_pat * yq + e_pat       # (1, 384)
        cam = b_pat * y_base + const_pat
    else:
        # General W: wrap count within the 128-pixel row. x_raw < W + 128, so
        # the guarded floor is exact for W < 2^21 (asserted in the wrapper).
        x_raw = x_base + q_pat                               # (rows, 384)
        wraps = jnp.floor((x_raw + 0.5) * inv_w)
        x = x_raw - w * wraps
        y = y_base + wraps
        cam = a_pat * x + b_pat * y + e_pat

    # ---- depth repeated 3x along lanes via one-hot matmuls on the (idle) MXU.
    # Exact 3-way bf16 split of the f32 depth (8+8+8 mantissa bits) preserves
    # full f32 precision regardless of the hardware matmul precision.
    p_mat = pmat_ref[...]                                    # (128, 384) bf16
    d = d_ref[0].astype(jnp.float32)                         # (rows, 128)
    d_hi = d.astype(jnp.bfloat16)
    r1 = d - d_hi.astype(jnp.float32)
    d_mid = r1.astype(jnp.bfloat16)
    d_lo = (r1 - d_mid.astype(jnp.float32)).astype(jnp.bfloat16)
    d_rep = (jnp.dot(d_hi, p_mat, preferred_element_type=jnp.float32)
             + jnp.dot(d_mid, p_mat, preferred_element_type=jnp.float32)
             + jnp.dot(d_lo, p_mat, preferred_element_type=jnp.float32))

    out_ref[0] = (d_rep * cam).astype(out_ref.dtype)


def _pick_tiling(hw128, batch, max_rows=4096, min_steps=4):
    """Choose (rows per grid step, padded hw128 extent).

    rows is a multiple of 8 (or the full padded extent) to satisfy the (8,128)
    block rule. Preference order: minimal padding, then >= min_steps grid steps
    (keeps both v7x TensorCores fed), then the largest tile (amortizes the
    ~0.35 us per-step pipeline overhead).
    """
    def ceil_to(x, m):
        return -(-x // m) * m

    cands = []
    if hw128 <= max_rows:
        cands.append((0, hw128, hw128))          # single full-extent block
    for rows in range(8, min(max_rows, ceil_to(hw128, 8)) + 1, 8):
        padded = ceil_to(hw128, rows)
        cands.append((padded - hw128, rows, padded))
    min_waste = min(c[0] for c in cands)
    good = [c for c in cands if c[0] == min_waste]
    enough = [c for c in good if batch * (c[2] // c[1]) >= min_steps]
    pool = enough or good
    _, rows, padded = max(pool, key=lambda c: c[1])
    return rows, padded


def d_to_cloud(depth, inv_K, *, max_rows=4096, out_dtype=None):
    """depth: (B, 1, H, W), inv_K: (B, 4, 4) -> (B, H*W, 3).

    out_dtype=jnp.bfloat16 halves the dominant output HBM traffic if the
    consumer tolerates bf16 points (default keeps depth.dtype).
    """
    B, _, H, W = depth.shape
    HW = H * W
    assert 1 <= W <= (1 << 21), "float index math assumes W < 2^21"
    out_dtype = depth.dtype if out_dtype is None else out_dtype

    hw128 = -(-HW // 128)
    rows, padded128 = _pick_tiling(hw128, B, max_rows=max_rows)
    nblk = padded128 // rows
    total = padded128 * 128
    assert total <= (1 << 22), "float index math assumes padded H*W <= 2^22"
    # TODO(synk): switch the in-kernel index math to int32 divmod for >4M pixels.

    d_flat = depth.reshape(B, HW)
    if total != HW:
        d_flat = jnp.pad(d_flat, ((0, 0), (0, total - HW)))
    depth_t = d_flat.reshape(B, padded128, 128)

    # Per-batch lane-coefficient slab (host-precomputed): coef[b,j,l] = inv_K[b, l%3, j].
    k3 = inv_K[:, :3, :3].astype(jnp.float32)
    c_idx = jnp.arange(384) % 3
    coef = jnp.transpose(k3[:, c_idx, :], (0, 2, 1))          # (B, 3, 384)

    # One-hot replication matrix (constant, stays VMEM-resident): P[i,l] = [l//3 == i].
    p_mat = (jnp.arange(384)[None, :] // 3
             == jnp.arange(128)[:, None]).astype(jnp.bfloat16)  # (128, 384)

    kernel = functools.partial(_d_to_cloud_kernel, width=W)

    in_bytes = rows * 128 * jnp.dtype(depth.dtype).itemsize
    out_bytes = rows * 384 * jnp.dtype(out_dtype).itemsize
    const_bytes = 128 * 384 * 2 + 3 * 384 * 4
    vmem_limit = min(32 * 1024 * 1024,
                     2 * (in_bytes + out_bytes + const_bytes) + 4 * 1024 * 1024)

    out = pl.pallas_call(
        kernel,
        out_shape=jax.ShapeDtypeStruct((B, padded128, 384), out_dtype),
        grid=(B, nblk),
        in_specs=[
            pl.BlockSpec((1, 3, 384), lambda b, t: (b, 0, 0)),    # coef (per batch)
            pl.BlockSpec((128, 384), lambda b, t: (0, 0)),        # p_mat (constant)
            pl.BlockSpec((1, rows, 128), lambda b, t: (b, t, 0)),  # depth tile
        ],
        out_specs=pl.BlockSpec((1, rows, 384), lambda b, t: (b, t, 0)),
        compiler_params=pltpu.CompilerParams(
            dimension_semantics=("parallel", "parallel"),
            vmem_limit_bytes=vmem_limit),
    )(coef, p_mat, depth_t)

    # (B, padded, 384) -> (B, padded*128, 3): free row-major reshape, then trim.
    out = out.reshape(B, padded128 * 128, 3)
    if total != HW:
        out = out[:, :HW]
    return out


def d_to_cloud_ref(depth, inv_K):
    B, _, H, W = depth.shape
    xs, ys = jnp.meshgrid(jnp.arange(W, dtype=depth.dtype),
                          jnp.arange(H, dtype=depth.dtype), indexing="xy")
    pix = jnp.stack([xs.reshape(-1), ys.reshape(-1),
                     jnp.ones((H * W,), depth.dtype)], axis=0)       # (3, HW)
    cam = jnp.einsum("bij,jn->bin", inv_K[:, :3, :3], pix,
                     precision=jax.lax.Precision.HIGHEST)            # (B, 3, HW)
    cam = depth.reshape(B, 1, -1) * cam
    return jnp.transpose(cam, (0, 2, 1))


if __name__ == "__main__":
    B, H, W = 2, 16, 16
    key = jax.random.PRNGKey(0)
    k_depth, k_invk = jax.random.split(key)

    depth = jax.random.uniform(k_depth, (B, 1, H, W), jnp.float32,
                               minval=0.1, maxval=10.0)
    inv_K = jnp.eye(4, dtype=jnp.float32)[None].repeat(B, axis=0)
    inv_K = inv_K + 0.01 * jax.random.normal(k_invk, (B, 4, 4), jnp.float32)

    out = d_to_cloud(depth, inv_K)
    out = jax.block_until_ready(out)

    ref = d_to_cloud_ref(depth, inv_K)
    assert out.shape == (B, H * W, 3), out.shape
    assert jnp.allclose(out, ref, atol=1e-4, rtol=1e-5), \
        float(jnp.max(jnp.abs(out - ref)))

    print("KERNEL_OK")
</pallas_src>

<mosaic_0001>
module attributes {stable_mosaic.version = 11 : i64} {
  func.func @_d_to_cloud_kernel(%arg0: i32, %arg1: i32, %arg2: memref<1x3x384xf32, #tpu.memory_space<vmem>>, %arg3: memref<128x384xbf16, #tpu.memory_space<vmem>>, %arg4: memref<1x2x128xf32, #tpu.memory_space<vmem>>, %arg5: memref<1x2x384xf32, #tpu.memory_space<vmem>>) attributes {dimension_semantics = [#tpu.dimension_semantics<parallel>, #tpu.dimension_semantics<parallel>], iteration_bounds = array<i64: 2, 1>, scalar_prefetch = 0 : i64, scratch_operands = 0 : i64, tpu.core_type = #tpu.core_type<tc>, window_params = [{transform_indices = @transform_0, window_bounds = array<i64: 1, 3, 384>}, {pipeline_mode = #tpu.pipeline_mode<synchronous>, transform_indices = @transform_1, window_bounds = array<i64: 128, 384>}, {transform_indices = @transform_2, window_bounds = array<i64: 1, 2, 128>}, {transform_indices = @transform_3, window_bounds = array<i64: 1, 2, 384>}]} {
    %0 = tpu.iota {dimensions = array<i32: 1>} : vector<1x384xi32>
    %1 = arith.sitofp %0 : vector<1x384xi32> to vector<1x384xf32>
    %cst = arith.constant 5.000000e-01 : f32
    %2 = vector.broadcast %cst : f32 to vector<1x384xf32>
    %3 = arith.addf %1, %2 : vector<1x384xf32>
    %cst_0 = arith.constant 0.333333343 : f32
    %4 = vector.broadcast %cst_0 : f32 to vector<1x384xf32>
    %5 = arith.mulf %3, %4 : vector<1x384xf32>
    %6 = math.floor %5 : vector<1x384xf32>
    %c0 = arith.constant 0 : index
    %c0_1 = arith.constant 0 : index
    %c0_2 = arith.constant 0 : index
    %7 = vector.load %arg2[%c0, %c0_1, %c0_2] : memref<1x3x384xf32, #tpu.memory_space<vmem>>, vector<1x3x384xf32>
    %8 = vector.shape_cast %7 : vector<1x3x384xf32> to vector<3x384xf32>
    %9 = vector.extract_strided_slice %8 {offsets = [0, 0], sizes = [1, 384], strides = [1, 1]} : vector<3x384xf32> to vector<1x384xf32>
    %10 = vector.extract_strided_slice %8 {offsets = [1, 0], sizes = [1, 384], strides = [1, 1]} : vector<3x384xf32> to vector<1x384xf32>
    %11 = vector.extract_strided_slice %8 {offsets = [2, 0], sizes = [1, 384], strides = [1, 1]} : vector<3x384xf32> to vector<1x384xf32>
    %12 = tpu.iota {dimensions = array<i32: 0>} : vector<2x1xi32>
    %13 = arith.sitofp %12 : vector<2x1xi32> to vector<2x1xf32>
    %c2_i32 = arith.constant 2 : i32
    %14 = arith.muli %arg1, %c2_i32 : i32
    %c128_i32 = arith.constant 128 : i32
    %15 = arith.muli %14, %c128_i32 : i32
    %16 = arith.sitofp %15 : i32 to f32
    %cst_3 = arith.constant 1.280000e+02 : f32
    %17 = vector.broadcast %cst_3 : f32 to vector<2x1xf32>
    %18 = arith.mulf %13, %17 : vector<2x1xf32>
    %19 = vector.broadcast %16 : f32 to vector<2x1xf32>
    %20 = arith.addf %19, %18 : vector<2x1xf32>
    %cst_4 = arith.constant 5.000000e-01 : f32
    %21 = vector.broadcast %cst_4 : f32 to vector<2x1xf32>
    %22 = arith.addf %20, %21 : vector<2x1xf32>
    %cst_5 = arith.constant 6.250000e-02 : f32
    %23 = vector.broadcast %cst_5 : f32 to vector<2x1xf32>
    %24 = arith.mulf %22, %23 : vector<2x1xf32>
    %25 = math.floor %24 : vector<2x1xf32>
    %cst_6 = arith.constant 1.600000e+01 : f32
    %26 = vector.broadcast %cst_6 : f32 to vector<2x1xf32>
    %27 = arith.mulf %25, %26 : vector<2x1xf32>
    %28 = arith.subf %20, %27 : vector<2x1xf32>
    %cst_7 = arith.constant 0.000000e+00 : f32
    %29 = vector.broadcast %cst_7 : f32 to vector<2x1xf32>
    %30 = arith.cmpf olt, %28, %29 : vector<2x1xf32>
    %cst_8 = arith.constant 1.000000e+00 : f32
    %31 = vector.broadcast %cst_8 : f32 to vector<2x1xf32>
    %32 = arith.subf %25, %31 : vector<2x1xf32>
    %33 = arith.select %30, %32, %25 : vector<2x1xi1>, vector<2x1xf32>
    %cst_9 = arith.constant 1.600000e+01 : f32
    %34 = vector.broadcast %cst_9 : f32 to vector<2x1xf32>
    %35 = arith.addf %28, %34 : vector<2x1xf32>
    %36 = arith.select %30, %35, %28 : vector<2x1xi1>, vector<2x1xf32>
    %cst_10 = arith.constant 1.600000e+01 : f32
    %37 = vector.broadcast %cst_10 : f32 to vector<2x1xf32>
    %38 = arith.cmpf oge, %36, %37 : vector<2x1xf32>
    %cst_11 = arith.constant 1.000000e+00 : f32
    %39 = vector.broadcast %cst_11 : f32 to vector<2x1xf32>
    %40 = arith.addf %33, %39 : vector<2x1xf32>
    %41 = arith.select %38, %40, %33 : vector<2x1xi1>, vector<2x1xf32>
    %cst_12 = arith.constant 5.000000e-01 : f32
    %42 = vector.broadcast %cst_12 : f32 to vector<1x384xf32>
    %43 = arith.addf %6, %42 : vector<1x384xf32>
    %cst_13 = arith.constant 6.250000e-02 : f32
    %44 = vector.broadcast %cst_13 : f32 to vector<1x384xf32>
    %45 = arith.mulf %43, %44 : vector<1x384xf32>
    %46 = math.floor %45 : vector<1x384xf32>
    %cst_14 = arith.constant 1.600000e+01 : f32
    %47 = vector.broadcast %cst_14 : f32 to vector<1x384xf32>
    %48 = arith.mulf %47, %46 : vector<1x384xf32>
    %49 = arith.subf %6, %48 : vector<1x384xf32>
    %50 = arith.mulf %9, %49 : vector<1x384xf32>
    %51 = arith.mulf %10, %46 : vector<1x384xf32>
    %52 = arith.addf %50, %51 : vector<1x384xf32>
    %53 = arith.addf %52, %11 : vector<1x384xf32>
    %54 = vector.broadcast %10 : vector<1x384xf32> to vector<2x384xf32>
    %55 = vector.broadcast %41 : vector<2x1xf32> to vector<2x384xf32>
    %56 = arith.mulf %54, %55 : vector<2x384xf32>
    %57 = vector.broadcast %53 : vector<1x384xf32> to vector<2x384xf32>
    %58 = arith.addf %56, %57 : vector<2x384xf32>
    %c0_15 = arith.constant 0 : index
    %c0_16 = arith.constant 0 : index
    %59 = vector.load %arg3[%c0_15, %c0_16] : memref<128x384xbf16, #tpu.memory_space<vmem>>, vector<128x384xbf16>
    %c0_17 = arith.constant 0 : index
    %c0_18 = arith.constant 0 : index
    %c0_19 = arith.constant 0 : index
    %60 = vector.load %arg4[%c0_17, %c0_18, %c0_19] : memref<1x2x128xf32, #tpu.memory_space<vmem>>, vector<1x2x128xf32>
    %61 = vector.shape_cast %60 : vector<1x2x128xf32> to vector<2x128xf32>
    %62 = arith.truncf %61 : vector<2x128xf32> to vector<2x128xbf16>
    %63 = arith.extf %62 : vector<2x128xbf16> to vector<2x128xf32>
    %64 = arith.subf %61, %63 : vector<2x128xf32>
    %65 = arith.truncf %64 : vector<2x128xf32> to vector<2x128xbf16>
    %66 = arith.extf %65 : vector<2x128xbf16> to vector<2x128xf32>
    %67 = arith.subf %64, %66 : vector<2x128xf32>
    %68 = arith.truncf %67 : vector<2x128xf32> to vector<2x128xbf16>
    %cst_20 = arith.constant dense<0.000000e+00> : vector<2x384xf32>
    %69 = tpu.matmul %62, %59, %cst_20 {dimension_numbers = #tpu.dot_dimension_numbers<[1], [0], [0], [1], [0, 0, 1, 1], [], []>} : vector<2x128xbf16>, vector<128x384xbf16>, vector<2x384xf32> -> vector<2x384xf32>
    %cst_21 = arith.constant dense<0.000000e+00> : vector<2x384xf32>
    %70 = tpu.matmul %65, %59, %cst_21 {dimension_numbers = #tpu.dot_dimension_numbers<[1], [0], [0], [1], [0, 0, 1, 1], [], []>} : vector<2x128xbf16>, vector<128x384xbf16>, vector<2x384xf32> -> vector<2x384xf32>
    %71 = arith.addf %69, %70 : vector<2x384xf32>
    %cst_22 = arith.constant dense<0.000000e+00> : vector<2x384xf32>
    %72 = tpu.matmul %68, %59, %cst_22 {dimension_numbers = #tpu.dot_dimension_numbers<[1], [0], [0], [1], [0, 0, 1, 1], [], []>} : vector<2x128xbf16>, vector<128x384xbf16>, vector<2x384xf32> -> vector<2x384xf32>
    %73 = arith.addf %71, %72 : vector<2x384xf32>
    %74 = arith.mulf %73, %58 : vector<2x384xf32>
    %c0_23 = arith.constant 0 : index
    %c0_24 = arith.constant 0 : index
    %c0_25 = arith.constant 0 : index
    %75 = vector.load %arg5[%c0_23, %c0_24, %c0_25] : memref<1x2x384xf32, #tpu.memory_space<vmem>>, vector<1x2x384xf32>
    %76 = vector.shape_cast %75 : vector<1x2x384xf32> to vector<2x384xf32>
    %77 = vector.shape_cast %74 : vector<2x384xf32> to vector<1x2x384xf32>
    tpu.vector_store %arg5[%c0_23, %c0_24, %c0_25], %77 {strides = array<i32>} : memref<1x2x384xf32, #tpu.memory_space<vmem>>, vector<1x2x384xf32>,
    return
  }
  func.func @transform_0(%arg0: i32, %arg1: i32) -> (i32, i32, i32) {
    %c0_i32 = arith.constant 0 : i32
    %c0_i32_0 = arith.constant 0 : i32
    %c0_i32_1 = arith.constant 0 : i32
    return %arg0, %c0_i32, %c0_i32_0 : i32, i32, i32
  }
  func.func @transform_1(%arg0: i32, %arg1: i32) -> (i32, i32) {
    %c0_i32 = arith.constant 0 : i32
    %c0_i32_0 = arith.constant 0 : i32
    %c0_i32_1 = arith.constant 0 : i32
    return %c0_i32, %c0_i32_0 : i32, i32
  }
  func.func @transform_2(%arg0: i32, %arg1: i32) -> (i32, i32, i32) {
    %c0_i32 = arith.constant 0 : i32
    %c0_i32_0 = arith.constant 0 : i32
    return %arg0, %arg1, %c0_i32 : i32, i32, i32
  }
  func.func @transform_3(%arg0: i32, %arg1: i32) -> (i32, i32, i32) {
    %c0_i32 = arith.constant 0 : i32
    %c0_i32_0 = arith.constant 0 : i32
    return %arg0, %arg1, %c0_i32 : i32, i32, i32
  }
}

</mosaic_0001>

<bundles_post_ra>
// kernel: tpu_custom_call.1
= control target key start
LH: loop header
LB: loop body
LE: loop exit
PB: predicated region body
PF: predicated region fallthrough
CT: control target
= control target key end

     0   :  { %8 = vsyncpa [#allocation3], 0  ;;  %s1622_s0 = inlined_call_operand.vmem [shape: f32[2,3,384], index: 0, kind: input, shape index: {}]   ;;  %s1623_s1 = inlined_call_operand.hbm [shape: bf16[128,384], index: 1, kind: input, shape index: {}]   ;;  %s1624_s2 = inlined_call_operand.vmem [shape: f32[2,2,128], index: 2, kind: input, shape index: {}]   ;;  %s1625_s3 = inlined_call_operand.hbm [shape: f32[2,2,384], index: 3, kind: output, shape index: {}]  }
   0x1   :  { %9 = vsyncpa [#allocation4], 0 }
   0x2   :  { %11 = vsyncpa [#allocation4 + $0x1], 0  ;;  %s1302_s12 = smov 0   ;;  %s1304_s13 = smov 0  }
   0x3   :  { %s1306_s14 = smov 0   ;;  %s1308_s15 = smov 0  }
   0x4   :  { %s1310_s16 = smov 0   ;;  %s1312_s17 = smov 0  }
   0x5 LB: > { %s931_s18 = sadd.s32 4294967295, %s1272_s17   ;;  %s932_s19 = sadd.s32 4294967294, %s1272_s17   ;;  %s1272_s17 = sphi %s1312_s17, %s17_s17   ;;  %s1268_s16 = sphi %s1310_s16, %s1634_s16   ;;  %s1264_s15 = sphi %s1308_s15, %s1633_s15   ;;  %s1260_s14 = sphi %s1306_s14, %s1632_s14   ;;  %s1256_s13 = sphi %s1304_s13, %s1631_s13   ;;  %s1252_s12 = sphi %s1302_s12, %s1630_s12  }
   0x6   : > { %s29_s20 = sadd.s32 1, %s1268_s16  ;;  %s113_s21 = sadd.s32 1, %s1260_s14 }
   0x7   : > { %p31_p0 = scmp.ge.s32.totalorder %s29_s20, 2  ;;  %p123_p1 = scmp.ne.s32.totalorder %s1260_s14, %s1256_s13 }
   0x8   : > { %p124_p2 = scmp.eq.s32.totalorder %s931_s18, 1  ;;  %p129_p3 = scmp.ne.s32.totalorder %s1256_s13, %s1252_s12 }
   0x9   : > { %s1636_s20 = smov (%p31_p0, %s29_s20), 0  ;;  %p130_p5 = scmp.eq.s32.totalorder %s932_s19, 1 }
   0xa   : > { %p1342_p4 = por %p124_p2, %p123_p1  ;;  %s108_s23 = ssub.s32 %s1268_s16, %s1636_s20 }
   0xb   : > { %p933_p6 = scmp.ge.s32.totalorder %s1272_s17, 1  ;;  %p111_p7 = scmp.eq.s32.totalorder %s108_s23, 0 }
   0xc   : > { %p1349_p8 = por %p130_p5, %p129_p3  ;;  %p137_p9 = scmp.lt.s32.totalorder %s1272_s17, 3 }
   0xd   : > { %s1355_s25 = scalar_select %p111_p7, %s1260_s14, %s113_s21  }
   0xe   : > { %p1357_p10 = pnand %p933_p6, %p137_p9  ;;  %p1361_p11 = scmp.eq.s32.totalorder %s931_s18, 0 }
   0xf   : > { %s1274_s28 = smov [#allocation2]  }
  0x10   : > { %p1068_p12 = pneg %p1357_p10  ;;  %s149_s29 = sshll.u32 %s1274_s28, 4  ;;  %s150_s29 = int_to_ptr.vmem [resolvable:$true] %s149_s29 }
  0x11   : > { %s1177_s30 = scalar_lea.vmem %s150_s29, 3072  ;;  %p1185_p5 = scmp.lt.s32.totalorder %s150_s29, %s150_s29 }
  0x12   : > { %p1069_p13 = pnand %p1361_p11, %p1068_p12  ;;  %p1178_p1 = scmp.ne.s32.totalorder %s150_s29, %s1177_s30 }
  0x13   : > { %p1186_p6 = scmp.lt.s32.totalorder %s1177_s30, %s1177_s30 }
  0x14   : > { %p1168_p0 = pneg %p1069_p13 }
  0x15   : > { %p1187_p7 = por %p1186_p6, %p1185_p5 }
  0x16   : > { %p1180_p2 = pnand %p1178_p1, %p1168_p0 }
  0x18   : > { %p1181_p3 = pneg %p1180_p2 }
  0x1a   : > { %p1188_p9 = pnand %p1187_p7, %p1181_p3 }
  0x1c   : > { %1191 = shalt.err (!%p1188_p9)
}
  0x1d   : > { %s1275_s4 = smov 192   ;;  %s1276_s5 = smov 12  }
  0x1e   : > { %1071 = dma.hbm_to_vmem [thread:$0]  (!%p1069_p13), %s1623_s1, 3072, %s150_s29, [#allocation3], %s1275_s4, %s1275_s4, %s1276_s5  }
  0x1f   : > { %183 = sbr.rel (%p1357_p10) target bundleno = 353 (0x161), region = 32 }
  0x24   : > { %1243 = dma.done.wait (%p1361_p11), [#allocation3], 3072  }
  0x25   : > { %1245 = vsyncadd (%p1361_p11), [#allocation3], 4294964224  ;;  %v1277_v0 = vmov 0.0   ;;  %vm1278_vm0 = vmmov 0   ;;  %v1279_v1 = vmov 0   ;;  %p214_p10 = scmp.lt.s32.totalorder %s1264_s15, 1  ;;  %v227_v34 = vlaneseq }
  0x26   : > { %999 = vmatprep.subr.bf16.mxu1 %v1277_v0  ;;  %1015 = vmatprep.mubr.msk.bf16.mxu1 %vm1278_vm0, %v1277_v0  ;;  %v1382_v2 = vld [vmem:[#allocation2 + $0xac] ss:$12 sps:$4 sm:$0xff]   ;;  %v1384_v3 = vld [vmem:[#allocation2 + $0xb0] ss:$12 sps:$4 sm:$0xff]   ;;  %v1387_v4 = vld [vmem:[#allocation2 + $0xa8] ss:$12 sps:$4 sm:$0xff]  }
  0x27   : > { %579 = vmatprep.mubr.bf16.mxu0 %v1279_v1  ;;  %547 = vmatprep.subr.bf16.mxu0 %v1382_v2  ;;  %v1390_v5 = vld [vmem:[#allocation2 + $0x94] ss:$12 sps:$4 sm:$0xff]   ;;  %v1394_v6 = vld [vmem:[#allocation2 + $0x98] ss:$12 sps:$4 sm:$0xff]   ;;  %v1396_v7 = vld [vmem:[#allocation2 + $0x90] ss:$12 sps:$4 sm:$0xff]  }
  0x28   : > { %1000 = vmatpush3.bf16.msra.mxu1 %v1384_v3  ;;  %548 = vmatpush1.bf16.msra.mxu0 %v1387_v4  ;;  %v1399_v8 = vld [vmem:[#allocation2 + $0x7c] ss:$12 sps:$4 sm:$0xff]   ;;  %v1403_v9 = vld [vmem:[#allocation2 + $0x80] ss:$12 sps:$4 sm:$0xff]   ;;  %v1407_v10 = vld [vmem:[#allocation2 + $0x78] ss:$12 sps:$4 sm:$0xff]  }
  0x29   : > { %1001 = vmatprep.subr.bf16.mxu1 %v1277_v0  ;;  %549 = vmatprep.subr.bf16.mxu0 %v1390_v5  ;;  %v1410_v11 = vld [vmem:[#allocation2 + $0x64] ss:$12 sps:$4 sm:$0xff]   ;;  %s1413_s8 = scalar_select %p214_p10, %s1264_s15, 1  ;;  %v1416_v12 = vld [vmem:[#allocation2 + $0x68] ss:$12 sps:$4 sm:$0xff]   ;;  %v228_v35 = vand.u32 127, %v227_v34 }
  0x2a   : > { %v1420_v13 = vld [vmem:[#allocation2 + $0x60] ss:$12 sps:$4 sm:$0xff]   ;;  %v1427_v15 = vld [vmem:[#allocation2 + $0x50] ss:$12 sps:$4 sm:$0xff]   ;;  %v1431_v16 = vld [vmem:[#allocation2 + $0x48] ss:$12 sps:$4 sm:$0xff]  }
  0x2b   : > { %v1423_v14 = vld [vmem:[#allocation2 + $0x4c] ss:$12 sps:$4 sm:$0xff]   ;;  %s939_s9 = sshll.u32 %s1413_s8, 1  ;;  %v1437_v17 = vld [vmem:[#allocation2 + $0x34] ss:$12 sps:$4 sm:$0xff]   ;;  %v229_v37 = vadd.s32 128, %v228_v35  ;;  %v231_v43 = vcvt.s32.f32 %v228_v35 }
  0x2c   : > { %1002 = vmatpush3.bf16.msra.mxu1 %v1394_v6  ;;  %550 = vmatpush1.bf16.msra.mxu0 %v1396_v7  ;;  %s225_s18 = scalar_lea.vmem %s1624_s2, %s939_s9  ;;  %v1440_v18 = vld [vmem:[#allocation2 + $0x38] ss:$12 sps:$4 sm:$0xff]   ;;  %v1444_v20 = vld [vmem:[#allocation2 + $0x30] ss:$12 sps:$4 sm:$0xff]   ;;  %v1450_v24 = vld [vmem:[#allocation2 + $0x20] ss:$12 sps:$4 sm:$0xff]  }
  0x2d   : > { %1003 = vmatprep.subr.bf16.mxu1 %v1277_v0  ;;  %551 = vmatprep.subr.bf16.mxu0 %v1399_v8  ;;  %v411_v19 = vld [vmem:[%s225_s18] sm:$0x3]  ;;  %v1447_v22 = vld [vmem:[#allocation2 + $0x1c] ss:$12 sps:$4 sm:$0xff]   ;;  %v1454_v25 = vld [vmem:[#allocation2 + $0x18] ss:$12 sps:$4 sm:$0xff]   ;;  %v232_v44 = vcvt.s32.f32 %v229_v37 }
  0x2e   : > { %v412_v21 = vpack.c.bf16 %v411_v19, %v411_v19  ;;  %v1457_v26 = vld [vmem:[#allocation2 + $0x4] ss:$12 sps:$4 sm:$0xff]   ;;  %v1462_v28 = vld [vmem:[#allocation2 + $0x8] ss:$12 sps:$4 sm:$0xff]   ;;  %v1466_v29 = vld [vmem:[#allocation2] ss:$12 sps:$4 sm:$0xff]  }
  0x2f   : > { %v230_v41 = vadd.s32 256, %v228_v35  ;;  %v234_v49 = vadd.f32 0.5, %v231_v43  ;;  %v235_v50 = vadd.f32 0.5, %v232_v44  ;;  %v1555_v54 = vshrl.u32 %v227_v34, 7  ;;  %s1060_s19 = smul.u32 12, %s1413_s8  ;;  %s211_s27 = sand.u32 1, %s1256_s13  }
  0x30   : > { %1004 = vmatpush3.bf16.msra.mxu1 %v1403_v9  ;;  %552 = vmatpush1.bf16.msra.mxu0 %v1407_v10  ;;  %v413_v23 = vunpack.c.l.bf16 %v412_v21  ;;  %s1059_s28 = smul.u32 6, %s211_s27  ;;  %s818_s8 = scalar_lea.sflag [#allocation4], %s211_s27 }
  0x31   : > { %1005 = vmatprep.subr.bf16.mxu1 %v1277_v0  ;;  %553 = vmatprep.subr.bf16.mxu0 %v1410_v11  ;;  %v233_v48 = vcvt.s32.f32 %v230_v41  ;;  %v237_v52 = vmul.f32 0.33333334, %v234_v49  ;;  %v238_v53 = vmul.f32 0.33333334, %v235_v50  ;;  %v247_v58 = vcvt.s32.f32 %v1555_v54  ;;  %s218_s26 = scalar_lea.vmem %s1622_s0, %s1060_s19  ;;  %s1061_s29 = smul.u32 96, %s1264_s15 }
  0x32   : > { %v1459_v27 = vsub.f32 %v411_v19, %v413_v23  ;;  %v243_v23 = vld [vmem:[%s218_s26] sm:$0x77]  ;;  %v319_v44 = vsub.s32 1, %v1555_v54  ;;  %v323_v49 = vsub.s32 5, %v1555_v54  ;;  %s213_s30 = scalar_lea.vmem [#allocation5], %s1059_s28  ;;  %s1281_s10 = smov [#allocation5]  }
  0x33   : > { %v236_v51 = vadd.f32 0.5, %v233_v48  ;;  %v240_v56 = vfloor.f32 %v237_v52  ;;  %v241_v57 = vfloor.f32 %v238_v53  ;;  %v250_v62 = vmul.f32 128.0, %v247_v58  ;;  %s834_s4 = sshll.u32 %s213_s30, 4  ;;  %s832_s7 = scalar_lea.hbm %s1625_s3, %s1061_s29  ;;  %s835_s4 = int_to_ptr.vmem [resolvable:$true] %s834_s4 }
  0x34   : > { %1006 = vmatpush3.bf16.msra.mxu1 %v1416_v12  ;;  %554 = vmatpush1.bf16.msra.mxu0 %v1420_v13  ;;  %v1471_v30 = vpack.c.bf16 %v1459_v27, %v1459_v27  ;;  %v351_v52 = vsub.s32 0, %v1555_v54  ;;  %v355_v58 = vsub.s32 4, %v1555_v54  ;;  %s1192_s9 = scalar_lea.vmem %s835_s4, 96  ;;  %s1196_s15 = sshll.u32 %s1281_s10, 4  ;;  %s1197_s15 = int_to_ptr.vmem [resolvable:$false] %s1196_s15 }
  0x35   : > { %1007 = vmatprep.subr.bf16.mxu1 %v1277_v0  ;;  %555 = vmatprep.subr.bf16.mxu0 %v1423_v14  ;;  %v239_v55 = vmul.f32 0.33333334, %v236_v51  ;;  %v266_v60 = vadd.f32 0.5, %v240_v56  ;;  %v267_v61 = vadd.f32 0.5, %v241_v57  ;;  %p1193_p11 = scmp.ne.s32.totalorder %s835_s4, %s1192_s9  ;;  %s1198_s11 = scalar_lea.vmem %s1197_s15, 192 }
  0x36   : > { %v416_v31 = vunpack.c.l.bf16 %v1471_v30  ;;  %p1199_p0 = scmp.lt.s32.totalorder %s835_s4, %s1197_s15  ;;  %p1200_p1 = scmp.lt.s32.totalorder %s1198_s11, %s1192_s9 }
  0x37   : > { %v242_v59 = vfloor.f32 %v239_v55  ;;  %p1194_p12 = pnand %p1193_p11, %p1342_p4 }
  0x38   : > { %1008 = vmatpush3.bf16.msra.mxu1 %v1427_v15  ;;  %556 = vmatpush1.bf16.msra.mxu0 %v1431_v16  ;;  %v417_v32 = vsub.f32 %v1459_v27, %v416_v31  ;;  %p1201_p2 = por %p1200_p1, %p1199_p0 }
  0x39   : > { %1009 = vmatprep.subr.bf16.mxu1 %v1277_v0  ;;  %557 = vmatprep.subr.bf16.mxu0 %v1437_v17  ;;  %v268_v63 = vadd.f32 0.5, %v242_v59  ;;  %p1195_p13 = pneg %p1194_p12 }
  0x3a   : > { %v418_v33 = vpack.c.bf16 %v417_v32, %v417_v32 }
  0x3b   : > { %p1202_p3 = pnand %p1201_p2, %p1195_p13 }
  0x3c   : > { %1010 = vmatpush3.bf16.msra.mxu1 %v1440_v18  ;;  %558 = vmatpush1.bf16.msra.mxu0 %v1444_v20 }
  0x3d   : > { %1011 = vmatprep.subr.bf16.mxu1 %v1277_v0  ;;  %559 = vmatprep.subr.bf16.mxu0 %v1447_v22 }
  0x40   : > { %1012 = vmatpush3.bf16.msra.mxu1 %v1450_v24  ;;  %560 = vmatpush1.bf16.msra.mxu0 %v1454_v25 }
  0x41   : > { %1013 = vmatprep.subr.bf16.mxu1 %v1277_v0  ;;  %561 = vmatprep.subr.bf16.mxu0 %v1457_v26 }
  0x44   : > { %1014 = vmatpush3.bf16.msra.mxu1 %v1462_v28  ;;  %562 = vmatpush1.bf16.msra.mxu0 %v1466_v29 }
  0x45   : > { %1019 = vmatprep.subr.bf16.mxu1 %v1277_v0  ;;  %628 = vmatprep.subr.bf16.mxu0 %v1382_v2 }
  0x47   : > { %1016 = vmatmul.mubr.bf16.vlgmr.msra.gmra.mxu1 %v1471_v30  ;;  %580 = vmatmul.mubr.bf16.vlgmr.msra.gmra.mxu0 %v1471_v30 }
  0x48   : > { %1020 = vmatpush3.bf16.msra.mxu1 %v1384_v3  ;;  %629 = vmatpush1.bf16.msra.mxu0 %v1387_v4 }
  0x49   : > { %1021 = vmatprep.subr.bf16.mxu1 %v1277_v0  ;;  %630 = vmatprep.subr.bf16.mxu0 %v1390_v5 }
  0x4a   : > { %1035 = vmatprep.mubr.msk.bf16.mxu1 %vm1278_vm0, %v1277_v0  ;;  %660 = vmatprep.mubr.bf16.mxu0 %v1279_v1 }
  0x4c   : > { %1022 = vmatpush3.bf16.msra.mxu1 %v1394_v6  ;;  %631 = vmatpush1.bf16.msra.mxu0 %v1396_v7 }
  0x4d   : > { %1023 = vmatprep.subr.bf16.mxu1 %v1277_v0  ;;  %632 = vmatprep.subr.bf16.mxu0 %v1399_v8 }
  0x50   : > { %1024 = vmatpush3.bf16.msra.mxu1 %v1403_v9  ;;  %633 = vmatpush1.bf16.msra.mxu0 %v1407_v10 }
  0x51   : > { %1025 = vmatprep.subr.bf16.mxu1 %v1277_v0  ;;  %634 = vmatprep.subr.bf16.mxu0 %v1410_v11 }
  0x54   : > { %1026 = vmatpush3.bf16.msra.mxu1 %v1416_v12  ;;  %635 = vmatpush1.bf16.msra.mxu0 %v1420_v13 }
  0x55   : > { %1027 = vmatprep.subr.bf16.mxu1 %v1277_v0  ;;  %636 = vmatprep.subr.bf16.mxu0 %v1423_v14 }
  0x58   : > { %1028 = vmatpush3.bf16.msra.mxu1 %v1427_v15  ;;  %637 = vmatpush1.bf16.msra.mxu0 %v1431_v16 }
  0x59   : > { %1029 = vmatprep.subr.bf16.mxu1 %v1277_v0  ;;  %638 = vmatprep.subr.bf16.mxu0 %v1437_v17 }
  0x5c   : > { %1030 = vmatpush3.bf16.msra.mxu1 %v1440_v18  ;;  %639 = vmatpush1.bf16.msra.mxu0 %v1444_v20 }
  0x5d   : > { %1031 = vmatprep.subr.bf16.mxu1 %v1277_v0  ;;  %640 = vmatprep.subr.bf16.mxu0 %v1447_v22 }
  0x60   : > { %1032 = vmatpush3.bf16.msra.mxu1 %v1450_v24  ;;  %641 = vmatpush1.bf16.msra.mxu0 %v1454_v25 }
  0x61   : > { %1033 = vmatprep.subr.bf16.mxu1 %v1277_v0  ;;  %642 = vmatprep.subr.bf16.mxu0 %v1457_v26 }
  0x64   : > { %1034 = vmatpush3.bf16.msra.mxu1 %v1462_v28  ;;  %643 = vmatpush1.bf16.msra.mxu0 %v1466_v29 }
  0x65   : > { %1039 = vmatprep.subr.bf16.mxu1 %v1277_v0  ;;  %709 = vmatprep.subr.bf16.mxu0 %v1382_v2  ;;  %v253_v2 = vadd.f32 0.5, %v250_v62 }
  0x67   : > { %1036 = vmatmul.mubr.bf16.vlgmr.msra.gmra.mxu1 %v412_v21  ;;  %661 = vmatmul.mubr.bf16.vlgmr.msra.gmra.mxu0 %v412_v21 }
  0x68   : > { %1040 = vmatpush3.bf16.msra.mxu1 %v1384_v3  ;;  %710 = vmatpush1.bf16.msra.mxu0 %v1387_v4  ;;  %v271_v3 = vmul.f32 0.0625, %v268_v63 }
  0x69   : > { %1041 = vmatprep.subr.bf16.mxu1 %v1277_v0  ;;  %711 = vmatprep.subr.bf16.mxu0 %v1390_v5 }
  0x6a   : > { %1055 = vmatprep.mubr.msk.bf16.mxu1 %vm1278_vm0, %v1277_v0  ;;  %741 = vmatprep.mubr.bf16.mxu0 %v1279_v1  ;;  %v270_v1 = vmul.f32 0.0625, %v267_v61 }
  0x6c   : > { %1042 = vmatpush3.bf16.msra.mxu1 %v1394_v6  ;;  %712 = vmatpush1.bf16.msra.mxu0 %v1396_v7  ;;  %v273_v5 = vfloor.f32 %v270_v1  ;;  %v254_v6 = vmul.f32 0.0625, %v253_v2  ;;  %v274_v7 = vfloor.f32 %v271_v3 }
  0x6d   : > { %1043 = vmatprep.subr.bf16.mxu1 %v1277_v0  ;;  %713 = vmatprep.subr.bf16.mxu0 %v1399_v8 }
  0x70   : > { %1044 = vmatpush3.bf16.msra.mxu1 %v1403_v9  ;;  %714 = vmatpush1.bf16.msra.mxu0 %v1407_v10  ;;  %v276_v10 = vmul.f32 16.0, %v273_v5 }
  0x71   : > { %1045 = vmatprep.subr.bf16.mxu1 %v1277_v0  ;;  %715 = vmatprep.subr.bf16.mxu0 %v1410_v11 }
  0x72   : > { %v279_v21 = vsub.f32 %v241_v57, %v276_v10  ;;  %v324_v57 = vrot.slane %v243_v23, %v323_v49 }
  0x74   : > { %1046 = vmatpush3.bf16.msra.mxu1 %v1416_v12  ;;  %716 = vmatpush1.bf16.msra.mxu0 %v1420_v13 }
  0x75   : > { %1047 = vmatprep.subr.bf16.mxu1 %v1277_v0  ;;  %717 = vmatprep.subr.bf16.mxu0 %v1423_v14  ;;  %v255_v14 = vfloor.f32 %v254_v6  ;;  %v1280_v6 = vmov 1983009808  }
  0x78   : > { %1048 = vmatpush3.bf16.msra.mxu1 %v1427_v15  ;;  %718 = vmatpush1.bf16.msra.mxu0 %v1431_v16  ;;  %v277_v16 = vmul.f32 16.0, %v274_v7 }
  0x79   : > { %1049 = vmatprep.subr.bf16.mxu1 %v1277_v0  ;;  %719 = vmatprep.subr.bf16.mxu0 %v1437_v17  ;;  %v292_v17 = vrot.slane %v274_v7, 7  ;;  %v801_v7 = vunpack.c.l.s4 %v1280_v6 }
  0x7c   : > { %1050 = vmatpush3.bf16.msra.mxu1 %v1440_v18  ;;  %720 = vmatpush1.bf16.msra.mxu0 %v1444_v20  ;;  %v244_v18 = vld [vmem:[%s218_s26 + $0x8] sm:$0x7] }
  0x7d   : > { %1051 = vmatprep.subr.bf16.mxu1 %v1277_v0  ;;  %721 = vmatprep.subr.bf16.mxu0 %v1447_v22  ;;  %v944_v43 = vrot.slane %v244_v18, 10  ;;  %v328_v51 = vrot.slane %v244_v18, %v319_v44 }
  0x80   : > { %1052 = vmatpush3.bf16.msra.mxu1 %v1450_v24  ;;  %722 = vmatpush1.bf16.msra.mxu0 %v1454_v25 }
  0x81   : > { %1053 = vmatprep.subr.bf16.mxu1 %v1277_v0  ;;  %723 = vmatprep.subr.bf16.mxu0 %v1457_v26  ;;  %v269_v0 = vmul.f32 0.0625, %v266_v60  ;;  %v256_v26 = vmul.f32 16.0, %v255_v14 }
  0x83   : > { %v272_v4 = vfloor.f32 %v269_v0  ;;  %v257_v32 = vsub.f32 %v250_v62, %v256_v26  ;;  %v339_v0 = vrot.slane %v324_v57, %v319_v44 }
  0x84   : > { %1054 = vmatpush3.bf16.msra.mxu1 %v1462_v28  ;;  %724 = vmatpush1.bf16.msra.mxu0 %v1466_v29  ;;  %v280_v28 = vsub.f32 %v242_v59, %v277_v16  ;;  %v296_v29 = vmul.f32 %v292_v17, %v244_v18  ;;  %v343_v59 = vrot.slane %v328_v51, %v319_v44 }
  0x85   : > { %v275_v9 = vmul.f32 16.0, %v272_v4  ;;  %v290_v11 = vcombine.low %v272_v4, %v273_v5  ;;  %vm258_vm1 = vcmp.lt.f32.partialorder %v257_v32, 0.0  ;;  %v261_v41 = vadd.f32 16.0, %v257_v32 }
  0x86   : > { %v942_v34 = vrot.slane %v296_v29, 9 }
  0x87   : > { %1056 = vmatmul.mubr.bf16.vlgmr.msra.gmra.mxu1 %v418_v33  ;;  %742 = vmatmul.mubr.bf16.vlgmr.msra.gmra.mxu0 %v418_v33  ;;  %v278_v20 = vsub.f32 %v240_v56, %v275_v9  ;;  %v291_v22 = vrot.slane %v290_v11, 7  ;;  %v286_v33 = vmul.f32 %v280_v28, %v244_v18  ;;  %v262_v48 = vsel %vm258_vm1, %v261_v41, %v257_v32 }
  0x88   : > { %v320_v56 = vrot.slane %v243_v23, %v319_v44  ;;  %vm263_vm2 = vcmp.ge.f32.partialorder %v262_v48, 16.0 }
  0x89   : > { %v283_v30 = vcombine.low %v278_v20, %v279_v21  ;;  %v295_v31 = vmul.f32 %v291_v22, %v243_v23  ;;  %v802_v21 = vunpack.c.0.s8 %v801_v7 }
  0x8a   : > { %v335_v62 = vrot.slane %v320_v56, %v319_v44 }
  0x8b   : > { %v285_v35 = vmul.f32 %v283_v30, %v243_v23  ;;  %v941_v37 = vrot.slane %v295_v31, 9 }
 0x107   : > { %v1549_v36 = vpop.f32.mrf.mxu1  ;;  %v1551_v38 = vpop.f32.mrf.mxu0 }
 0x109   : > { %v1017_v39 = vpop.f32.mrf.mxu1  ;;  %v1553_v40 = vpop.f32.mrf.mxu0 }
 0x10a   : > { %v940_v39 = vadd.f32 -1.0, %v255_v14 }
 0x10b   : > { %v625_v42 = vpop.f32.mrf.mxu1  ;;  %v585_v45 = vpop.f32.mrf.mxu0 }
 0x10c   : > { %v306_v42 = vadd.f32 %v942_v34, %v286_v33  ;;  %v305_v45 = vadd.f32 %v941_v37, %v285_v35 }
 0x10d   : > { %v1018_v46 = vpop.f32.mrf.mxu1  ;;  %v586_v47 = vpop.f32.mrf.mxu0 }
 0x10e   : > { %v943_v46 = vrot.slane %v243_v23, 10  ;;  %v260_v47 = vsel %vm258_vm1, %v940_v39, %v255_v14  ;;  %v316_v50 = vadd.f32 %v944_v43, %v306_v42 }
 0x10f   : > { %v264_v53 = vadd.f32 1.0, %v260_v47 }
 0x110   : > { %v315_v55 = vadd.f32 %v943_v46, %v305_v45  ;;  %v360_v60 = vrot.slane %v316_v50, %v351_v52 }
 0x111   : > { %v265_v61 = vsel %vm263_vm2, %v264_v53, %v260_v47 }
 0x112   : > { %v352_v63 = vrot.slane %v315_v55, %v351_v52  ;;  %v356_v1 = vrot.slane %v315_v55, %v355_v58  ;;  %v346_v2 = vmul.f32 %v343_v59, %v265_v61  ;;  %v375_v3 = vrot.slane %v360_v60, %v351_v52 }
 0x113   : > { %v344_v4 = vmul.f32 %v335_v62, %v265_v61  ;;  %v345_v9 = vmul.f32 %v339_v0, %v265_v61 }
 0x114   : > { %v367_v5 = vrot.slane %v352_v63, %v351_v52  ;;  %v371_v10 = vrot.slane %v356_v1, %v351_v52 }
 0x116   : > { %v376_v17 = vadd.f32 %v367_v5, %v344_v4 }
 0x127   : > { %v1559_v8 = vpop.f32.mrf.mxu1  ;;  %v1564_v12 = vpop.f32.mrf.mxu0 }
 0x128   : > { %v704_v11 = vadd.f32 %v1559_v8, %v1549_v36  ;;  %v663_v14 = vadd.f32 %v1564_v12, %v1551_v38  ;;  %v805_v12 = vsub.s32 %v802_v21, %v1555_v54 }
 0x129   : > { %v1037_v13 = vpop.f32.mrf.mxu1  ;;  %v1566_v15 = vpop.f32.mrf.mxu0 }
 0x12a   : > { %v378_v13 = vadd.f32 %v375_v3, %v346_v2  ;;  %v665_v20 = vadd.f32 %v1566_v15, %v1553_v40 }
 0x12b   : > { %v706_v19 = vpop.f32.mrf.mxu1  ;;  %v666_v24 = vpop.f32.mrf.mxu0 }
 0x12c   : > { %v377_v24 = vadd.f32 %v371_v10, %v345_v9 }
 0x12d   : > { %v1038_v25 = vpop.f32.mrf.mxu1  ;;  %v667_v27 = vpop.f32.mrf.mxu0 }
 0x147   : > { %v784_v16 = vpop.f32.mrf.mxu1  ;;  %v743_v19 = vpop.f32.mrf.mxu0 }
 0x148   : > { %v792_v18 = vadd.f32 %v784_v16, %v704_v11  ;;  %v790_v22 = vadd.f32 %v743_v19, %v663_v14 }
 0x149   : > { %v1057_v23 = vpop.f32.mrf.mxu1  ;;  %v745_v8 = vpop.f32.mrf.mxu0 }
 0x14a   : > { %v795_v36 = vmul.f32 %v792_v18, %v378_v13  ;;  %v793_v25 = vmul.f32 %v790_v22, %v376_v17  ;;  %v791_v26 = vadd.f32 %v745_v8, %v665_v20 }
 0x14b   : > { %v787_v27 = vpop.f32.mrf.mxu1  ;;  %v747_v38 = vpop.f32.mrf.mxu0 }
 0x14c   : > { %v794_v28 = vmul.f32 %v791_v26, %v377_v24  ;;  %v813_v30 = vrot.slane %v795_v36, %v805_v12 }
 0x14d   : > { %v1058_v29 = vpop.f32.mrf.mxu1  ;;  %v748_v40 = vpop.f32.mrf.mxu0 }
 0x14e   : > { %v799_v15 = vcombine.low %v793_v25, %v794_v28 }
 0x150   : > { %v806_v31 = vrot.slane %v799_v15, %v805_v12 }
 0x152   : > { %v814_v32 = vcombine.low %v806_v31, %v813_v30 }
 0x154   : > { %816 = vst [vmem:[%s213_s30] sm:$0x3f] %v814_v32 }
 0x155   : > { %1205 = shalt.err (!%p1202_p3)
}
 0x156   : > { %s1206_s18 = scalar_lea.hbm %s832_s7, 96  ;;  %s1210_s23 = scalar_lea.hbm %s1625_s3, 192 }
 0x157   : > { %p1207_p5 = scmp.ne.s32.totalorder %s832_s7, %s1206_s18  ;;  %p1211_p9 = scmp.lt.s32.totalorder %s832_s7, %s1625_s3 }
 0x158   : > { %p1212_p10 = scmp.lt.s32.totalorder %s1210_s23, %s1206_s18 }
 0x159   : > { %p1208_p6 = pnand %p1207_p5, %p1342_p4 }
 0x15a   : > { %p1213_p11 = por %p1212_p10, %p1211_p9 }
 0x15b   : > { %p1209_p7 = pneg %p1208_p6 }
 0x15d   : > { %p1214_p12 = pnand %p1213_p11, %p1209_p7 }
 0x15f   : > { %1217 = shalt.err (!%p1214_p12)
}
 0x160   : > { %1066 = dma.vmem_to_hbm [thread:$0]  (%p1342_p4), %s835_s4, 96, %s832_s7, %s818_s8  }
 0x161 PF: > { %p1078_p13 = scmp.ge.s32.totalorder %s1272_s17, 2  ;;  %s846_s28 = sand.u32 1, %s1252_s12  }
 0x162   : > { %s847_s29 = scalar_lea.sflag [#allocation4], %s846_s28 }
 0x163   : > { %p1073_p0 = pnand %p1078_p13, %p1349_p8 }
 0x165   : > { %p1074_p1 = pneg %p1073_p0 }
 0x167   : > { %1247 = dma.done.wait (%p1074_p1), %s847_s29, 96  }
 0x168   : > { %1249 = vsyncadd (%p1074_p1), %s847_s29, 4294967200  ;;  %s17_s17 = sadd.s32 1, %s1272_s17   ;;  %s1630_s12 = smov %s1256_s13 }
 0x169   : > { %p14_p2 = scmp.ge.s32.totalorder %s17_s17, 4   ;;  %s1631_s13 = smov %s1260_s14 }
 0x16a   : > { %s1632_s14 = smov %s1355_s25  ;;  %s1633_s15 = smov %s1268_s16 }
 0x16b   : > { %s1634_s16 = smov %s1636_s20  ;;  %16 = sbr.rel (!%p14_p2) target bundleno = 5 (0x5), region = 75 }
 0x170   :  { %852 = vsyncpa [#allocation3], 1 }
 0x171   :  { %854 = vsyncpa [#allocation3 + $0x1], 1 }
 0x172   :  { %855 = vsyncpa [#allocation4], 1 }
 0x173   :  { %857 = vsyncpa [#allocation4 + $0x1], 1 }

</bundles_post_ra>
